<compile_context>
chip_gen: v7x
topology: tpu7x:2x2x1
jax: 0.10.0
libtpu: 0.0.40
codegen_flags: <defaults>
</compile_context>

<pallas_src>
import numpy as np
import jax
import jax.numpy as jnp
from jax.experimental import pallas as pl
from jax.experimental.pallas import tpu as pltpu


def _normalize_axes(axes: tuple[int, ...], ndim: int) -> tuple[int, ...]:
    return tuple(ax if ax >= 0 else ndim + ax for ax in axes)


def _round_up(x: int, m: int) -> int:
    return ((x + m - 1) // m) * m


def _sublane(itemsize: int) -> int:
    # Native sublane packing multiple per element width.
    return {4: 8, 2: 16, 1: 32}.get(int(itemsize), 8)


def _vmem_capacity_bytes() -> int:
    """Per-TensorCore VMEM capacity; conservative 64 MiB (v7x) if unknown."""
    cap = 64 << 20
    try:
        cap = int(pltpu.get_tpu_info().vmem_capacity_bytes)
    except Exception:
        pass
    return cap


def _fit_tile(dim: int, target: int, align: int) -> int:
    """Pick a tile for `dim`: cover it when small, otherwise prefer a tile
    that divides `dim` exactly (no padding), falling back to minimal padding."""
    dim = max(int(dim), 1)
    if dim <= target:
        return _round_up(dim, align)
    low = max(align, target // 2)
    best_t, best_pad = None, None
    t = (target // align) * align
    while t >= low:
        pad = _round_up(dim, t) - dim
        if pad == 0:
            return t                       # exact divisor: zero padding
        if best_pad is None or pad < best_pad:
            best_t, best_pad = t, pad
        t -= align
    return best_t if best_t is not None else target


def _select_tiles(M: int, K: int, N: int, x_isize: int, w_isize: int,
                  out_isize: int, use_scratch: bool):
    """Returns (tm, tn, tk, vmem_limit_bytes)."""
    sub = max(_sublane(x_isize), _sublane(out_isize))
    cap = _vmem_capacity_bytes()
    budget = int(cap * 0.70)               # headroom for compiler scratch

    # tn spans all of N when moderate -> activations stream from HBM once.
    tn = _fit_tile(N, 2048, 128)
    tk = _fit_tile(K, 512, 128)
    tm = _fit_tile(M, 512, sub)

    def footprint(tm_, tn_, tk_):
        b = 2 * (tm_ * tk_ * x_isize + tk_ * tn_ * w_isize + tm_ * tn_ * out_isize)
        if use_scratch:
            b += tm_ * tn_ * 4
        return b

    # Shrink (tm first, then tn, then tk) until the double-buffered footprint
    # fits the per-generation VMEM budget.
    while footprint(tm, tn, tk) > budget:
        if tm > 256 and (tm // 2) % sub == 0:
            tm //= 2
        elif tn > 512 and (tn // 2) % 128 == 0:
            tn //= 2
        elif tk > 256 and (tk // 2) % 128 == 0:
            tk //= 2
        elif tm > sub and (tm // 2) % sub == 0:
            tm //= 2
        else:
            break

    # v7x megacore: expose >= 2 tiles across the parallel (M, N) axes so the
    # second TensorCore has work (no-op cost on single-TC v5e/v6e).
    def n_tiles(dim, t):
        return -(-max(dim, 1) // t)
    if n_tiles(M, tm) * n_tiles(N, tn) < 2:
        if tm >= 2 * sub and (tm // 2) % sub == 0:
            tm //= 2
        elif tn >= 256 and (tn // 2) % 128 == 0:
            tn //= 2

    needed = footprint(tm, tn, tk)
    vmem_limit = int(min(cap, max(needed + (8 << 20), 32 << 20)))
    return tm, tn, tk, vmem_limit


def _mm_kernel_inplace(x_ref, w_ref, o_ref):
    """f32 output: accumulate directly into the resident output block."""
    k = pl.program_id(2)
    prod = jnp.dot(x_ref[...].astype(w_ref.dtype), w_ref[...],
                   preferred_element_type=jnp.float32)

    @pl.when(k == 0)
    def _():
        o_ref[...] = prod

    @pl.when(k > 0)
    def _():
        o_ref[...] += prod


def _mm_kernel_scratch(x_ref, w_ref, o_ref, acc_ref):
    """Narrow output dtype: f32 VMEM accumulator, cast on the last K step."""
    k = pl.program_id(2)
    prod = jnp.dot(x_ref[...].astype(w_ref.dtype), w_ref[...],
                   preferred_element_type=jnp.float32)

    @pl.when(k == 0)
    def _():
        acc_ref[...] = prod

    @pl.when(k > 0)
    def _():
        acc_ref[...] += prod

    @pl.when(k == pl.num_programs(2) - 1)
    def _():
        o_ref[...] = acc_ref[...].astype(o_ref.dtype)


def _tiled_matmul(x2d: jax.Array, w2d: jax.Array, out_dtype,
                  tm: int, tn: int, tk: int, vmem_limit: int) -> jax.Array:
    """(M, K) @ (K, N) with f32 accumulation on a (M/tm, N/tn, K/tk) grid."""
    M, K = x2d.shape
    _, N = w2d.shape
    M_pad, K_pad, N_pad = _round_up(M, tm), _round_up(K, tk), _round_up(N, tn)

    # Pad only the axes that actually need it (zero fill -> padded K tail
    # contributes 0 to the accumulator). The divisor-aware tile picker makes
    # this a no-op for typical shapes.
    if (M_pad, K_pad) != (M, K):
        x2d = jnp.pad(x2d, ((0, M_pad - M), (0, K_pad - K)))
    if (K_pad, N_pad) != (K, N):
        w2d = jnp.pad(w2d, ((0, K_pad - K), (0, N_pad - N)))

    grid = (M_pad // tm, N_pad // tn, K_pad // tk)

    inplace = jnp.dtype(out_dtype) == jnp.dtype(jnp.float32)
    kernel = _mm_kernel_inplace if inplace else _mm_kernel_scratch
    scratch = [] if inplace else [pltpu.VMEM((tm, tn), jnp.float32)]

    cost = pl.CostEstimate(
        flops=2 * M_pad * N_pad * K_pad,
        transcendentals=0,
        bytes_accessed=(M_pad * K_pad * x2d.dtype.itemsize * (N_pad // tn)
                        + K_pad * N_pad * w2d.dtype.itemsize * (M_pad // tm)
                        + M_pad * N_pad * jnp.dtype(out_dtype).itemsize),
    )

    out = pl.pallas_call(
        kernel,
        out_shape=jax.ShapeDtypeStruct((M_pad, N_pad), out_dtype),
        grid_spec=pltpu.PrefetchScalarGridSpec(
            num_scalar_prefetch=0,
            grid=grid,
            in_specs=[
                pl.BlockSpec((tm, tk), lambda i, j, k: (i, k)),
                pl.BlockSpec((tk, tn), lambda i, j, k: (k, j)),
            ],
            out_specs=pl.BlockSpec((tm, tn), lambda i, j, k: (i, j)),
            scratch_shapes=scratch,
        ),
        compiler_params=pltpu.CompilerParams(
            dimension_semantics=("parallel", "parallel", "arbitrary"),
            vmem_limit_bytes=vmem_limit,
        ),
        cost_estimate=cost,
    )(x2d, w2d)

    if (M_pad, N_pad) != (M, N):
        out = out[:M, :N]
    return out


def dense_general(
    inputs: jax.Array,
    weight: jax.Array,
    in_shapes: tuple[int, ...],
    out_features: tuple[int, ...],
    axis: tuple[int, ...] = (-1,),
    *,
    allow_small_fallback: bool = True,
) -> jax.Array:
    """Pallas equivalent of DenseGeneral.forward:

    output = tensordot(inputs.astype(weight.dtype), weight,
                       dims=(norm_axis, range(len(norm_axis)))).astype(inputs.dtype)
    """
    norm_axis = _normalize_axes(axis, inputs.ndim)
    batch_axes = tuple(i for i in range(inputs.ndim) if i not in norm_axis)

    # Skip the transpose entirely when the contracted axes are already trailing
    # (the common axis=(-1,) layout) — avoids an HBM round trip.
    perm = batch_axes + norm_axis
    x = inputs if perm == tuple(range(inputs.ndim)) else jnp.transpose(inputs, perm)

    batch_shape = tuple(inputs.shape[i] for i in batch_axes)
    contract_shape = tuple(inputs.shape[i] for i in norm_axis)

    M = int(np.prod(batch_shape)) if batch_shape else 1
    K = int(np.prod(contract_shape)) if contract_shape else 1
    N = int(np.prod(out_features)) if out_features else 1

    x2d = x.reshape(M, K)
    w2d = weight.reshape(K, N)
    out_dtype = inputs.dtype

    # Torch semantics cast inputs to the weight dtype.  If that is a DOWNcast
    # (e.g. f32 activations, bf16 weights) do it once in the wrapper so the A
    # panel streams at the narrow width; widening casts stay in-kernel (free
    # when dtypes already match).
    if jnp.dtype(weight.dtype).itemsize < jnp.dtype(x2d.dtype).itemsize:
        x2d = x2d.astype(weight.dtype)

    if allow_small_fallback and (M < 8 or K < 128 or N < 128):
        # Far below one MXU tile: pallas_call + DMA setup dominates — let XLA
        # fuse a plain dot instead.
        out2d = jnp.dot(
            x2d.astype(weight.dtype), w2d, preferred_element_type=jnp.float32
        ).astype(out_dtype)
    else:
        use_scratch = jnp.dtype(out_dtype) != jnp.dtype(jnp.float32)
        tm, tn, tk, vmem_limit = _select_tiles(
            M, K, N,
            x2d.dtype.itemsize, w2d.dtype.itemsize, jnp.dtype(out_dtype).itemsize,
            use_scratch,
        )
        out2d = _tiled_matmul(x2d, w2d, out_dtype, tm, tn, tk, vmem_limit)

    return out2d.reshape(batch_shape + tuple(out_features))


if __name__ == "__main__":
    key = jax.random.PRNGKey(0)
    k1, k2, k3, k4, k5, k6 = jax.random.split(key, 6)

    # --- Test 1: the module's toy config (batch=2, seq=8, hidden=32 -> (16, 4)).
    # Force the Pallas path (K/N padded up to 128 lanes) so the kernel itself is
    # exercised; by default shapes this small take the XLA fallback.
    in_shapes, out_features = (32,), (16, 4)
    x_small = jax.random.normal(k1, (2, 8, 32), dtype=jnp.float32)
    w_small = jax.random.normal(k2, in_shapes + out_features, dtype=jnp.float32) * 0.02

    out_small = dense_general(x_small, w_small, in_shapes, out_features, (-1,),
                              allow_small_fallback=False)
    out_small = jax.block_until_ready(out_small)

    ref_small = jnp.tensordot(
        x_small.astype(w_small.dtype), w_small, axes=((2,), (0,)),
        precision=jax.lax.Precision.HIGHEST).astype(x_small.dtype)
    assert out_small.shape == (2, 8, 16, 4), out_small.shape
    np.testing.assert_allclose(np.asarray(out_small), np.asarray(ref_small),
                               rtol=1e-5, atol=1e-5)

    # --- Test 2: exercises the tiled grid, the f32 in-place output accumulator
    # and the dual-TC >=2-parallel-tile guarantee (no padding needed here).
    in_shapes2, out_features2 = (1024,), (32, 8)
    x_big = jax.random.normal(k3, (2, 256, 1024), dtype=jnp.float32)
    w_big = jax.random.normal(k4, in_shapes2 + out_features2, dtype=jnp.float32) * 0.02

    out_big = dense_general(x_big, w_big, in_shapes2, out_features2, (-1,))
    out_big = jax.block_until_ready(out_big)

    ref_big = jnp.tensordot(
        x_big.astype(w_big.dtype), w_big, axes=((2,), (0,)),
        precision=jax.lax.Precision.HIGHEST).astype(x_big.dtype)
    assert out_big.shape == (2, 256, 32, 8), out_big.shape
    np.testing.assert_allclose(np.asarray(out_big), np.asarray(ref_big),
                               rtol=1e-4, atol=1e-4)

    # --- Test 3: bf16 activations+weights -> exercises the scratch-accumulator
    # kernel, bf16 sublane (16) tile rounding and the lane-dense bf16 output.
    in_shapes3, out_features3 = (512,), (8, 16)
    x_bf16 = jax.random.normal(k5, (2, 128, 512), dtype=jnp.bfloat16)
    w_bf16 = (jax.random.normal(k6, in_shapes3 + out_features3,
                                dtype=jnp.bfloat16) * 0.02).astype(jnp.bfloat16)

    out_bf16 = dense_general(x_bf16, w_bf16, in_shapes3, out_features3, (-1,))
    out_bf16 = jax.block_until_ready(out_bf16)

    ref_bf16 = jnp.tensordot(
        x_bf16.astype(jnp.float32), w_bf16.astype(jnp.float32), axes=((2,), (0,)),
        precision=jax.lax.Precision.HIGHEST).astype(jnp.bfloat16)
    assert out_bf16.shape == (2, 128, 8, 16), out_bf16.shape
    np.testing.assert_allclose(np.asarray(out_bf16, dtype=np.float32),
                               np.asarray(ref_bf16, dtype=np.float32),
                               rtol=2e-2, atol=2e-2)

    print("KERNEL_OK")
</pallas_src>

<mosaic_0001>
module attributes {stable_mosaic.version = 11 : i64} {
  func.func @_mm_kernel_inplace(%arg0: i32, %arg1: i32, %arg2: i32, %arg3: memref<8x128xf32, #tpu.memory_space<vmem>>, %arg4: memref<128x128xf32, #tpu.memory_space<vmem>>, %arg5: memref<8x128xf32, #tpu.memory_space<vmem>>) attributes {dimension_semantics = [#tpu.dimension_semantics<parallel>, #tpu.dimension_semantics<parallel>, #tpu.dimension_semantics<arbitrary>], iteration_bounds = array<i64: 2, 1, 1>, scalar_prefetch = 0 : i64, scratch_operands = 0 : i64, tpu.core_type = #tpu.core_type<tc>, window_params = [{transform_indices = @transform_0, window_bounds = array<i64: 8, 128>}, {transform_indices = @transform_1, window_bounds = array<i64: 128, 128>}, {transform_indices = @transform_2, window_bounds = array<i64: 8, 128>}]} {
    %c0 = arith.constant 0 : index
    %c0_0 = arith.constant 0 : index
    %0 = vector.load %arg3[%c0, %c0_0] : memref<8x128xf32, #tpu.memory_space<vmem>>, vector<8x128xf32>
    %c0_1 = arith.constant 0 : index
    %c0_2 = arith.constant 0 : index
    %1 = vector.load %arg4[%c0_1, %c0_2] : memref<128x128xf32, #tpu.memory_space<vmem>>, vector<128x128xf32>
    %cst = arith.constant dense<0.000000e+00> : vector<8x128xf32>
    %2 = tpu.matmul %0, %1, %cst {dimension_numbers = #tpu.dot_dimension_numbers<[1], [0], [0], [1], [0, 0, 1, 1], [], []>} : vector<8x128xf32>, vector<128x128xf32>, vector<8x128xf32> -> vector<8x128xf32>
    %c0_i32 = arith.constant 0 : i32
    %3 = arith.cmpi eq, %arg2, %c0_i32 : i32
    %4 = arith.extui %3 : i1 to i32
    %c0_i32_3 = arith.constant 0 : i32
    %5 = arith.cmpi ne, %4, %c0_i32_3 : i32
    scf.if %5 {
      %c0_6 = arith.constant 0 : index
      %c0_7 = arith.constant 0 : index
      %9 = vector.load %arg5[%c0_6, %c0_7] : memref<8x128xf32, #tpu.memory_space<vmem>>, vector<8x128xf32>
      tpu.vector_store %arg5[%c0_6, %c0_7], %2 {strides = array<i32>} : memref<8x128xf32, #tpu.memory_space<vmem>>, vector<8x128xf32>,
    } else {
    }
    %c0_i32_4 = arith.constant 0 : i32
    %6 = arith.cmpi sgt, %arg2, %c0_i32_4 : i32
    %7 = arith.extui %6 : i1 to i32
    %c0_i32_5 = arith.constant 0 : i32
    %8 = arith.cmpi ne, %7, %c0_i32_5 : i32
    scf.if %8 {
      %c0_6 = arith.constant 0 : index
      %c0_7 = arith.constant 0 : index
      %9 = vector.load %arg5[%c0_6, %c0_7] : memref<8x128xf32, #tpu.memory_space<vmem>>, vector<8x128xf32>
      %10 = arith.addf %9, %2 : vector<8x128xf32>
      %c0_8 = arith.constant 0 : index
      %c0_9 = arith.constant 0 : index
      %11 = vector.load %arg5[%c0_8, %c0_9] : memref<8x128xf32, #tpu.memory_space<vmem>>, vector<8x128xf32>
      tpu.vector_store %arg5[%c0_8, %c0_9], %10 {strides = array<i32>} : memref<8x128xf32, #tpu.memory_space<vmem>>, vector<8x128xf32>,
    } else {
    }
    return
  }
  func.func @transform_0(%arg0: i32, %arg1: i32, %arg2: i32) -> (i32, i32) {
    %c0_i32 = arith.constant 0 : i32
    return %arg0, %arg2 : i32, i32
  }
  func.func @transform_1(%arg0: i32, %arg1: i32, %arg2: i32) -> (i32, i32) {
    %c0_i32 = arith.constant 0 : i32
    return %arg2, %arg1 : i32, i32
  }
  func.func @transform_2(%arg0: i32, %arg1: i32, %arg2: i32) -> (i32, i32) {
    %c0_i32 = arith.constant 0 : i32
    return %arg0, %arg1 : i32, i32
  }
}

</mosaic_0001>

<bundles_post_ra>
// kernel: tpu_custom_call.1
= control target key start
LH: loop header
LB: loop body
LE: loop exit
PB: predicated region body
PF: predicated region fallthrough
CT: control target
= control target key end

     0   :  { %7 = vsyncpa [#allocation3], 0  ;;  %s980_s0 = inlined_call_operand.hbm [shape: f32[16,128], index: 0, kind: input, shape index: {}]   ;;  %s981_s1 = inlined_call_operand.hbm [shape: f32[128,128], index: 1, kind: input, shape index: {}]   ;;  %s982_s2 = inlined_call_operand.hbm [shape: f32[16,128], index: 2, kind: output, shape index: {}]  }
   0x1   :  { %9 = vsyncpa [#allocation3 + $0x1], 0 }
   0x2   :  { %10 = vsyncpa [#allocation6], 0 }
   0x3   :  { %11 = vsyncpa [#allocation4], 0 }
   0x4   :  { %13 = vsyncpa [#allocation4 + $0x1], 0  ;;  %s759_s9 = smov 0   ;;  %s761_s10 = smov 0  }
   0x5   :  { %s763_s11 = smov 0   ;;  %s765_s12 = smov 0  }
   0x6   :  { %s767_s13 = smov 0   ;;  %s769_s14 = smov 0  }
   0x7 LB: > { %s421_s15 = sadd.s32 4294967295, %s734_s14   ;;  %s422_s16 = sadd.s32 4294967294, %s734_s14   ;;  %s734_s14 = sphi %s769_s14, %s19_s14   ;;  %s730_s13 = sphi %s767_s13, %s1006_s13   ;;  %s726_s12 = sphi %s765_s12, %s1005_s12   ;;  %s722_s11 = sphi %s763_s11, %s1004_s11   ;;  %s718_s10 = sphi %s761_s10, %s1003_s10   ;;  %s714_s9 = sphi %s759_s9, %s1002_s9  }
   0x8   : > { %p60_p0 = scmp.ne.s32.totalorder %s718_s10, %s714_s9  ;;  %p793_p1 = scmp.eq.s32.totalorder %s421_s15, 0 }
   0x9   : > { %p797_p2 = scmp.eq.s32.totalorder %s421_s15, 1  ;;  %p120_p3 = scmp.eq.s32.totalorder %s422_s16, 1 }
   0xa   : > { %s987_s17 = scalar_select %p793_p1, 1, 0 }
   0xb   : > { %s988_s18 = scalar_select %p797_p2, 1, 0 }
   0xc   : > { %p803_p4 = por %p793_p1, %p60_p0  ;;  %p423_p5 = scmp.ge.s32.totalorder %s734_s14, 1 }
   0xd   : > { %p808_p6 = por %p120_p3, %p60_p0  ;;  %p127_p7 = scmp.lt.s32.totalorder %s734_s14, 3 }
   0xe   : > { %s989_s19 = scalar_select %p803_p4, 1, 0 }
   0xf   : > { %s990_s20 = scalar_select %p808_p6, 1, 0 }
  0x10   : > { %p813_p8 = pnand %p423_p5, %p127_p7  ;;  %s736_s22 = smov [#allocation5]  }
  0x11   : > { %s143_s23 = sshll.u32 %s736_s22, 4  ;;  %s38_s25 = sadd.s32 1, %s730_s13  ;;  %s144_s23 = int_to_ptr.vmem [resolvable:$true] %s143_s23 }
  0x12   : > { %s991_s21 = scalar_select %p813_p8, 1, 0 }
  0x13   : > { %p520_p9 = pneg %p813_p8  ;;  %s590_s28 = scalar_lea.hbm %s981_s1, 2048 }
  0x14   : > { %p591_p12 = scmp.ne.s32.totalorder %s981_s1, %s590_s28  ;;  %p597_p5 = scmp.lt.u32.totalorder %s590_s28, %s981_s1 }
  0x15   : > { %p822_p11 = pnand %p520_p9, %p793_p1 }
  0x17   : > { %p592_p13 = pneg %p822_p11 }
  0x19   : > { %p593_p0 = pnand %p592_p13, %p591_p12 }
  0x1b   : > { %p594_p3 = pneg %p593_p0 }
  0x1d   : > { %p599_p7 = pnand %p597_p5, %p594_p3 }
  0x1f   : > { %602 = shalt.err (!%p599_p7)
}
  0x20   : > { %s603_s5 = scalar_lea.vmem %s144_s23, 2048  ;;  %p611_p1 = scmp.lt.s32.totalorder %s144_s23, %s144_s23 }
  0x21   : > { %p604_p9 = scmp.ne.s32.totalorder %s144_s23, %s603_s5  ;;  %p612_p4 = scmp.lt.s32.totalorder %s603_s5, %s603_s5 }
  0x23   : > { %p606_p10 = pnand %p604_p9, %p592_p13  ;;  %p613_p8 = por %p612_p4, %p611_p1 }
  0x25   : > { %p607_p6 = pneg %p606_p10 }
  0x27   : > { %p614_p2 = pnand %p613_p8, %p607_p6 }
  0x29   : > { %617 = shalt.err (!%p614_p2)
}
  0x2a   : > { %s737_s6 = smov 128   ;;  %s738_s7 = smov 8  }
  0x2b   : > { %523 = dma.hbm_to_vmem [thread:$0]  (!%p822_p11), %s981_s1, 2048, %s144_s23, [#allocation6], %s737_s6, %s737_s6, %s738_s7  }
  0x2c   : > { %p40_p1 = scmp.ge.s32.totalorder %s38_s25, 2  ;;  %s47_s16 = sadd.s32 1, %s722_s11 }
  0x2d   : > { %p54_p2 = scmp.ne.s32.totalorder %s722_s11, %s718_s10  ;;  %p55_p4 = scmp.eq.s32.totalorder %s734_s14, 0 }
  0x2e   : > { %s1008_s25 = smov (%p40_p1, %s38_s25), 0  ;;  %p994_p8 = scmp.ne.s32.totalorder %s988_s18, 0 }
  0x2f   : > { %p849_p6 = por %p55_p4, %p54_p2  ;;  %s42_s24 = ssub.s32 %s730_s13, %s1008_s25 }
  0x30   : > { %p855_p10 = por %p994_p8, %p54_p2  ;;  %p533_p12 = scmp.lt.s32.totalorder %s734_s14, 2 }
  0x31   : > { %p45_p11 = scmp.eq.s32.totalorder %s42_s24, 0  ;;  %s157_s23 = sand.u32 1, %s722_s11  }
  0x32   : > { %s426_s27 = sshll.u32 %s157_s23, 3  ;;  %s427_s29 = sshll.u32 %s730_s13, 7 }
  0x33   : > { %s864_s28 = scalar_select %p45_p11, %s722_s11, %s47_s16  }
  0x34   : > { %s870_s4 = scalar_lea.hbm %s980_s0, %s427_s29  ;;  %s161_s18 = scalar_lea.vmem [#allocation2], %s426_s27 }
  0x35   : > { %s169_s5 = sshll.u32 %s161_s18, 4  ;;  %p876_p13 = pnand %p533_p12, %p849_p6  ;;  %s872_s5 = int_to_ptr.vmem [resolvable:$true] %s169_s5 }
  0x36   : > { %s158_s7 = scalar_lea.sflag [#allocation3], %s157_s23  ;;  %s618_s8 = scalar_lea.hbm %s870_s4, 128 }
  0x37   : > { %p619_p0 = scmp.ne.s32.totalorder %s870_s4, %s618_s8  ;;  %p620_p3 = pneg %p876_p13 }
  0x38   : > { %s623_s24 = scalar_lea.hbm %s980_s0, 256  ;;  %p624_p9 = scmp.lt.u32.totalorder %s870_s4, %s980_s0 }
  0x39   : > { %p621_p5 = pnand %p620_p3, %p619_p0  ;;  %p625_p1 = scmp.lt.u32.totalorder %s623_s24, %s618_s8 }
  0x3a   : > { %p627_p4 = scmp.lt.u32.totalorder %s618_s8, %s870_s4 }
  0x3b   : > { %p622_p7 = pneg %p621_p5  ;;  %p626_p2 = por %p625_p1, %p624_p9 }
  0x3d   : > { %p628_p6 = por %p627_p4, %p626_p2 }
  0x3f   : > { %p629_p8 = pnand %p628_p6, %p622_p7 }
  0x41   : > { %632 = shalt.err (!%p629_p8)
}
  0x42   : > { %s633_s23 = scalar_lea.vmem %s872_s5, 128  ;;  %s739_s29 = smov [#allocation2]  }
  0x43   : > { %p634_p12 = scmp.ne.s32.totalorder %s872_s5, %s633_s23  ;;  %s638_s30 = sshll.u32 %s739_s29, 4  ;;  %s639_s30 = int_to_ptr.vmem [resolvable:$false] %s638_s30 }
  0x44   : > { %s640_s3 = scalar_lea.vmem %s639_s30, 256  ;;  %p641_p5 = scmp.lt.s32.totalorder %s872_s5, %s639_s30 }
  0x45   : > { %p636_p11 = pnand %p634_p12, %p620_p3  ;;  %p642_p9 = scmp.lt.s32.totalorder %s640_s3, %s633_s23 }
  0x47   : > { %p637_p0 = pneg %p636_p11  ;;  %p643_p1 = por %p642_p9, %p641_p5 }
  0x49   : > { %p644_p2 = pnand %p643_p1, %p637_p0 }
  0x4b   : > { %647 = shalt.err (!%p644_p2)
}
  0x4c   : > { %527 = dma.hbm_to_vmem [thread:$0]  (!%p876_p13), %s870_s4, 128, %s872_s5, %s158_s7  }
  0x4d   : > { %p997_p7 = scmp.ne.s32.totalorder %s991_s21, 0 }
  0x4e   : > { %s908_s18 = sand.u32 (!%p997_p7), 1, %s718_s10   ;;  %p998_p3 = scmp.ne.s32.totalorder (!%p997_p7), %s989_s19, 0 }
  0x4f   : > { %178 = sbr.rel (%p997_p7) target bundleno = 351 (0x15f), region = 28  ;;  %s429_s8 = sshll.u32 (!%p997_p7), %s908_s18, 3 }
  0x50   : > { %s181_s15 = scalar_lea.sflag (!%p997_p7), [#allocation3], %s908_s18  ;;  %s914_s16 = scalar_lea.vmem (!%p997_p7), [#allocation2], %s429_s8 }
  0x56   : > { %701 = dma.done.wait (%p998_p3), %s181_s15, 128  }
  0x57   : > { %703 = vsyncadd (%p998_p3), %s181_s15, 4294967168  ;;  %p999_p13 = scmp.ne.s32.totalorder %s987_s17, 0 }
  0x59   : > { %705 = dma.done.wait (%p999_p13), [#allocation6], 2048  }
  0x5a   : > { %707 = vsyncadd (%p999_p13), [#allocation6], 4294965248  ;;  %v740_v0 = vmov 0.0|0.0   ;;  %vm741_vm0 = vmmov 0   ;;  %v742_v1 = vmov 0.0   ;;  %v211_v2 = vld [vmem:[#allocation5] sm:$0xff] }
  0x5b   : > { %488 = vmatprep.subr.bf16.mxu0 %v740_v0  ;;  %485 = vmatprep.mubr.msk.f32.mxu0 %vm741_vm0, %v742_v1  ;;  %v212_v3 = vld [vmem:[#allocation5 + $0x8] sm:$0xff]  ;;  %v213_v4 = vld [vmem:[#allocation5 + $0x10] sm:$0xff]  ;;  %v214_v6 = vld [vmem:[#allocation5 + $0x18] sm:$0xff]  ;;  %s208_s17 = scalar_lea.vmem [#allocation7], %s429_s8  ;;  %s433_s21 = sshll.u32 %s726_s12, 7 }
  0x5c   : > { %v489_v5 = vpack.c.bf16 %v212_v3, %v211_v2  ;;  %v492_v7 = vpack.c.bf16 %v214_v6, %v213_v4  ;;  %v215_v8 = vld [vmem:[#allocation5 + $0x20] sm:$0xff]  ;;  %v216_v9 = vld [vmem:[#allocation5 + $0x28] sm:$0xff]  ;;  %v217_v11 = vld [vmem:[#allocation5 + $0x30] sm:$0xff]  ;;  %s324_s19 = sshll.u32 %s208_s17, 4  ;;  %s933_s6 = scalar_lea.hbm %s982_s2, %s433_s21  ;;  %s928_s19 = int_to_ptr.vmem [resolvable:$true] %s324_s19 }
  0x5d   : > { %v495_v10 = vpack.c.bf16 %v216_v9, %v215_v8  ;;  %v218_v12 = vld [vmem:[#allocation5 + $0x38] sm:$0xff]  ;;  %v219_v14 = vld [vmem:[#allocation5 + $0x40] sm:$0xff]  ;;  %v220_v15 = vld [vmem:[#allocation5 + $0x48] sm:$0xff]  ;;  %s310_s7 = scalar_lea.sflag [#allocation4], %s908_s18  ;;  %s648_s24 = scalar_lea.vmem %s928_s19, 128 }
  0x5e   : > { %490 = vmatpush3.bf16.msra.mxu0 %v489_v5  ;;  %v498_v13 = vpack.c.bf16 %v218_v12, %v217_v11  ;;  %v501_v16 = vpack.c.bf16 %v220_v15, %v219_v14  ;;  %v221_v17 = vld [vmem:[#allocation5 + $0x50] sm:$0xff]  ;;  %v222_v18 = vld [vmem:[#allocation5 + $0x58] sm:$0xff]  ;;  %v223_v20 = vld [vmem:[#allocation5 + $0x60] sm:$0xff]  ;;  %p649_p4 = scmp.ne.s32.totalorder %s928_s19, %s648_s24  ;;  %s743_s12 = smov [#allocation7]  }
  0x5f   : > { %491 = vmatprep.subr.bf16.mxu0 %v740_v0  ;;  %v504_v19 = vpack.c.bf16 %v222_v18, %v221_v17  ;;  %v224_v21 = vld [vmem:[#allocation5 + $0x68] sm:$0xff]  ;;  %v225_v23 = vld [vmem:[#allocation5 + $0x70] sm:$0xff]  ;;  %v226_v24 = vld [vmem:[#allocation5 + $0x78] sm:$0xff]  ;;  %s652_s22 = sshll.u32 %s743_s12, 4  ;;  %s653_s22 = int_to_ptr.vmem [resolvable:$false] %s652_s22 }
  0x60   : > { %v507_v22 = vpack.c.bf16 %v224_v21, %v223_v20  ;;  %v510_v25 = vpack.c.bf16 %v226_v24, %v225_v23  ;;  %v210_v26 = vld [vmem:[%s914_s16] sm:$0xff]  ;;  %p650_p6 = pnand %p649_p4, %p855_p10  ;;  %s654_s27 = scalar_lea.vmem %s653_s22, 256 }
  0x61   : > { %p655_p12 = scmp.lt.s32.totalorder %s928_s19, %s653_s22  ;;  %p656_p11 = scmp.lt.s32.totalorder %s654_s27, %s648_s24 }
  0x62   : > { %493 = vmatpush3.bf16.msra.mxu0 %v492_v7  ;;  %p651_p8 = pneg %p650_p6 }
  0x63   : > { %494 = vmatprep.subr.bf16.mxu0 %v740_v0  ;;  %p657_p0 = por %p656_p11, %p655_p12 }
  0x65   : > { %p658_p5 = pnand %p657_p0, %p651_p8 }
  0x66   : > { %496 = vmatpush3.bf16.msra.mxu0 %v495_v10 }
  0x67   : > { %497 = vmatprep.subr.bf16.mxu0 %v740_v0 }
  0x6a   : > { %499 = vmatpush3.bf16.msra.mxu0 %v498_v13 }
  0x6b   : > { %500 = vmatprep.subr.bf16.mxu0 %v740_v0 }
  0x6e   : > { %502 = vmatpush3.bf16.msra.mxu0 %v501_v16 }
  0x6f   : > { %503 = vmatprep.subr.bf16.mxu0 %v740_v0 }
  0x72   : > { %505 = vmatpush3.bf16.msra.mxu0 %v504_v19 }
  0x73   : > { %506 = vmatprep.subr.bf16.mxu0 %v740_v0 }
  0x76   : > { %508 = vmatpush3.bf16.msra.mxu0 %v507_v22 }
  0x77   : > { %509 = vmatprep.subr.bf16.mxu0 %v740_v0 }
  0x7a   : > { %511 = vmatpush3.bf16.msra.mxu0 %v510_v25 }
  0x7d   : > { %486 = vmatmul.mubr.f32.vlgmr.msra.gmra.mrb[0].mxu0 %v210_v26 }
 0x150   : > { %v293_v27 = vpop.f32.mrb[0].mxu0 }
 0x151   : > { %301 = vst [vmem:[%s208_s17] sm:$0xff] %v293_v27  ;;  %v487_v28 = vpop.f32.mrb[1].mxu0 }
 0x152   : > { %661 = shalt.err (!%p658_p5)
}
 0x153   : > { %s662_s23 = scalar_lea.hbm %s933_s6, 128  ;;  %s666_s3 = scalar_lea.hbm %s982_s2, 256 }
 0x154   : > { %p663_p9 = scmp.ne.s32.totalorder %s933_s6, %s662_s23  ;;  %p667_p7 = scmp.lt.u32.totalorder %s933_s6, %s982_s2 }
 0x155   : > { %p668_p3 = scmp.lt.u32.totalorder %s666_s3, %s662_s23  ;;  %p670_p4 = scmp.lt.u32.totalorder %s662_s23, %s933_s6 }
 0x156   : > { %p664_p1 = pnand %p663_p9, %p855_p10 }
 0x157   : > { %p669_p13 = por %p668_p3, %p667_p7 }
 0x158   : > { %p665_p2 = pneg %p664_p1 }
 0x159   : > { %p671_p6 = por %p670_p4, %p669_p13 }
 0x15b   : > { %p672_p8 = pnand %p671_p6, %p665_p2 }
 0x15d   : > { %675 = shalt.err (!%p672_p8)
}
 0x15e   : > { %518 = dma.vmem_to_hbm [thread:$0]  (%p855_p10), %s928_s19, 128, %s933_s6, %s310_s7  }
 0x15f PF: > { %s336_s15 = sand.u32 1, %s714_s9   ;;  %p1000_p12 = scmp.ne.s32.totalorder %s990_s20, 0 }
 0x160   : > { %p1001_p11 = scmp.ge.s32.totalorder %s734_s14, 2  ;;  %s337_s16 = scalar_lea.sflag [#allocation4], %s336_s15 }
 0x162   : > { %p529_p0 = pnand %p1001_p11, %p1000_p12 }
 0x164   : > { %709 = dma.done.wait (!%p529_p0), %s337_s16, 128  }
 0x165   : > { %711 = vsyncadd (!%p529_p0), %s337_s16, 4294967168  ;;  %s19_s14 = sadd.s32 1, %s734_s14   ;;  %s1002_s9 = smov %s718_s10 }
 0x166   : > { %p16_p5 = scmp.ge.s32.totalorder %s19_s14, 4   ;;  %s1003_s10 = smov %s722_s11 }
 0x167   : > { %s1004_s11 = smov %s864_s28  ;;  %s1005_s12 = smov %s730_s13 }
 0x168   : > { %s1006_s13 = smov %s1008_s25  ;;  %18 = sbr.rel (!%p16_p5) target bundleno = 7 (0x7), region = 86 }
 0x16f   :  { %342 = vsyncpa [#allocation3], 1 }
 0x170   :  { %344 = vsyncpa [#allocation3 + $0x1], 1 }
 0x171   :  { %345 = vsyncpa [#allocation6], 1 }
 0x172   :  { %346 = vsyncpa [#allocation4], 1 }
 0x173   :  { %348 = vsyncpa [#allocation4 + $0x1], 1 }

</bundles_post_ra>
